<compile_context>
chip_gen: v6e
topology: v6e:2x2x1
jax: 0.10.0
libtpu: 0.0.40
codegen_flags: <defaults>
</compile_context>

<pallas_src>
import jax
import jax.numpy as jnp
from jax.experimental import pallas as pl
from jax.experimental.pallas import tpu as pltpu


def _spectral_mul_kernel(x_ref, w_ref, o_ref):
    # x_ref : (2, B, Cin, 1, M)   packed [real, imag] input spectrum (one corner)
    # w_ref : (2, Cin, Cout, M)   packed [real, imag] weights (same corner)
    # o_ref : (2, B, Cout, M)     packed [real, imag] output spectrum
    xr = x_ref[0]                      # (B, Cin, 1, M)
    xi = x_ref[1]
    wr = w_ref[0]                      # (Cin, Cout, M)
    wi = w_ref[1]
    # 3-mult complex multiply (Karatsuba), contracted over Cin:
    #   real = wr*xr - wi*xi = k1 - xi*(wr+wi)
    #   imag = wr*xi + wi*xr = k1 + xr*(wi-wr)
    # with k1 = wr*(xr+xi).  Broadcast (B,Cin,1,M) x (Cin,Cout,M) -> (B,Cin,Cout,M),
    # then reduce the Cin axis (axis=1).
    k1 = wr * (xr + xi)                                  # (B, Cin, Cout, M)
    o_ref[0] = jnp.sum(k1 - xi * (wr + wi), axis=1)      # (B, Cout, M)  real
    o_ref[1] = jnp.sum(k1 + xr * (wi - wr), axis=1)      # (B, Cout, M)  imag


def _pallas_compl_mul(x_packed, w_packed):
    """x_packed: (2, 2, B, Cin, 1, M) f32  [corner, real/imag, ...]
    w_packed: (2, 2, Cin, Cout, M) f32.
    Returns (2, 2, B, Cout, M) f32 with out[s, :, b, o] = x[s, :, b, i] * w[s, :, i, o]
    (complex multiply, summed over i)."""
    S, _, B, Cin, _, M = x_packed.shape
    Cout = w_packed.shape[3]

    x_spec = pl.BlockSpec((None, 2, B, Cin, 1, M), lambda s: (s, 0, 0, 0, 0, 0))
    w_spec = pl.BlockSpec((None, 2, Cin, Cout, M), lambda s: (s, 0, 0, 0, 0))
    o_spec = pl.BlockSpec((None, 2, B, Cout, M), lambda s: (s, 0, 0, 0, 0))

    return pl.pallas_call(
        _spectral_mul_kernel,
        out_shape=jax.ShapeDtypeStruct((S, 2, B, Cout, M), jnp.float32),
        grid_spec=pltpu.PrefetchScalarGridSpec(
            num_scalar_prefetch=0,
            grid=(S,),
            in_specs=[x_spec, w_spec],
            out_specs=o_spec,
        ),
        compiler_params=pltpu.CompilerParams(
            dimension_semantics=("parallel",),
        ),
    )(x_packed, w_packed)


def spectral_conv2d(x, w1, w2, modes1, modes2):
    """x: (B, Cin, H, W) float32 (NCHW).  w1, w2: (Cin, Cout, m1, m2) complex64.
    Returns (B, Cout, H, W) float32 — same semantics as the PyTorch forward."""
    B, Cin, H, W = x.shape
    Cout = w1.shape[1]
    Wf = W // 2 + 1
    M = modes1 * modes2
    # Keep the two retained corners disjoint / in range (standard FNO assumption).
    assert 2 * modes1 <= H and modes2 <= Wf, (modes1, modes2, H, Wf)

    # FFT (no Pallas equivalent; XLA FFT).
    x_ft = jnp.fft.rfft2(x)                              # (B, Cin, H, Wf) complex64

    # Slice the two retained mode corners and stack them.
    top = x_ft[:, :, :modes1, :modes2]
    bot = x_ft[:, :, H - modes1:, :modes2]
    xs = jnp.stack([top, bot], axis=0)                   # (2, B, Cin, m1, m2) complex
    ws = jnp.stack([w1, w2], axis=0)                     # (2, Cin, Cout, m1, m2) complex

    # Pack real/imag into one array each (halves refs / DMA descriptors),
    # flatten (m1, m2) -> M for a lane-dense trailing axis, and give x a
    # singleton sublane dim so the in-kernel broadcast over Cout is layout-free.
    x_packed = jnp.stack([xs.real, xs.imag], axis=1).astype(jnp.float32)
    x_packed = x_packed.reshape(2, 2, B, Cin, 1, M)
    w_packed = jnp.stack([ws.real, ws.imag], axis=1).astype(jnp.float32)
    w_packed = w_packed.reshape(2, 2, Cin, Cout, M)

    out_packed = _pallas_compl_mul(x_packed, w_packed)   # (2, 2, B, Cout, M)

    out_modes = (out_packed[:, 0] + 1j * out_packed[:, 1]).astype(jnp.complex64)
    out_modes = out_modes.reshape(2, B, Cout, modes1, modes2)

    out_ft = jnp.zeros((B, Cout, H, Wf), dtype=jnp.complex64)
    out_ft = out_ft.at[:, :, :modes1, :modes2].set(out_modes[0])
    out_ft = out_ft.at[:, :, H - modes1:, :modes2].set(out_modes[1])

    # Inverse FFT back to physical space.
    return jnp.fft.irfft2(out_ft, s=(H, W)).astype(jnp.float32)


def _reference(x, w1, w2, modes1, modes2):
    """Pure-JAX reference reproducing the PyTorch forward exactly."""
    B, Cin, H, W = x.shape
    Cout = w1.shape[1]
    Wf = W // 2 + 1
    x_ft = jnp.fft.rfft2(x)
    out_ft = jnp.zeros((B, Cout, H, Wf), dtype=jnp.complex64)
    out_ft = out_ft.at[:, :, :modes1, :modes2].set(
        jnp.einsum("bixy,ioxy->boxy", x_ft[:, :, :modes1, :modes2], w1))
    out_ft = out_ft.at[:, :, H - modes1:, :modes2].set(
        jnp.einsum("bixy,ioxy->boxy", x_ft[:, :, H - modes1:, :modes2], w2))
    return jnp.fft.irfft2(out_ft, s=(H, W)).astype(jnp.float32)


if __name__ == "__main__":
    # Small shapes consistent with the module: batch=2, in/out channels=4,
    # spatial 16x16, modes1=modes2=6.
    B, Cin, Cout, H, W = 2, 4, 4, 16, 16
    modes1, modes2 = 6, 6

    key = jax.random.PRNGKey(0)
    kx, kw1r, kw1i, kw2r, kw2i = jax.random.split(key, 5)

    x = jax.random.normal(kx, (B, Cin, H, W), dtype=jnp.float32)

    # Deterministic parameter init mirroring torch.rand on cfloat:
    # scale * (U[0,1) + i * U[0,1)).
    scale = 1.0 / (Cin * Cout)
    w1 = scale * (jax.random.uniform(kw1r, (Cin, Cout, modes1, modes2), dtype=jnp.float32)
                  + 1j * jax.random.uniform(kw1i, (Cin, Cout, modes1, modes2), dtype=jnp.float32))
    w2 = scale * (jax.random.uniform(kw2r, (Cin, Cout, modes1, modes2), dtype=jnp.float32)
                  + 1j * jax.random.uniform(kw2i, (Cin, Cout, modes1, modes2), dtype=jnp.float32))
    w1 = w1.astype(jnp.complex64)
    w2 = w2.astype(jnp.complex64)

    out = jax.block_until_ready(spectral_conv2d(x, w1, w2, modes1, modes2))
    ref = jax.block_until_ready(_reference(x, w1, w2, modes1, modes2))

    assert out.shape == (B, Cout, H, W), out.shape
    assert jnp.allclose(out, ref, atol=1e-4, rtol=1e-4), float(jnp.max(jnp.abs(out - ref)))

    print("KERNEL_OK")
</pallas_src>

<mosaic_0001>
module attributes {stable_mosaic.version = 11 : i64} {
  func.func @_spectral_mul_kernel(%arg0: i32, %arg1: memref<1x2x2x4x1x36xf32, #tpu.memory_space<vmem>>, %arg2: memref<1x2x4x4x36xf32, #tpu.memory_space<vmem>>, %arg3: memref<1x2x2x4x36xf32, #tpu.memory_space<vmem>>) attributes {dimension_semantics = [#tpu.dimension_semantics<parallel>], iteration_bounds = array<i64: 2>, scalar_prefetch = 0 : i64, scratch_operands = 0 : i64, tpu.core_type = #tpu.core_type<tc>, window_params = [{transform_indices = @transform_0, window_bounds = array<i64: 1, 2, 2, 4, 1, 36>}, {transform_indices = @transform_1, window_bounds = array<i64: 1, 2, 4, 4, 36>}, {transform_indices = @transform_2, window_bounds = array<i64: 1, 2, 2, 4, 36>}]} {
    %c0 = arith.constant 0 : index
    %c0_0 = arith.constant 0 : index
    %c0_1 = arith.constant 0 : index
    %c0_2 = arith.constant 0 : index
    %c0_3 = arith.constant 0 : index
    %c0_4 = arith.constant 0 : index
    %0 = vector.load %arg1[%c0, %c0_0, %c0_1, %c0_2, %c0_3, %c0_4] : memref<1x2x2x4x1x36xf32, #tpu.memory_space<vmem>>, vector<1x1x2x4x1x36xf32>
    %1 = vector.shape_cast %0 : vector<1x1x2x4x1x36xf32> to vector<2x4x1x36xf32>
    %c0_5 = arith.constant 0 : index
    %c1 = arith.constant 1 : index
    %c0_6 = arith.constant 0 : index
    %c0_7 = arith.constant 0 : index
    %c0_8 = arith.constant 0 : index
    %c0_9 = arith.constant 0 : index
    %2 = vector.load %arg1[%c0_5, %c1, %c0_6, %c0_7, %c0_8, %c0_9] : memref<1x2x2x4x1x36xf32, #tpu.memory_space<vmem>>, vector<1x1x2x4x1x36xf32>
    %3 = vector.shape_cast %2 : vector<1x1x2x4x1x36xf32> to vector<2x4x1x36xf32>
    %c0_10 = arith.constant 0 : index
    %c0_11 = arith.constant 0 : index
    %c0_12 = arith.constant 0 : index
    %c0_13 = arith.constant 0 : index
    %c0_14 = arith.constant 0 : index
    %4 = vector.load %arg2[%c0_10, %c0_11, %c0_12, %c0_13, %c0_14] : memref<1x2x4x4x36xf32, #tpu.memory_space<vmem>>, vector<1x1x4x4x36xf32>
    %5 = vector.shape_cast %4 : vector<1x1x4x4x36xf32> to vector<4x4x36xf32>
    %c0_15 = arith.constant 0 : index
    %c1_16 = arith.constant 1 : index
    %c0_17 = arith.constant 0 : index
    %c0_18 = arith.constant 0 : index
    %c0_19 = arith.constant 0 : index
    %6 = vector.load %arg2[%c0_15, %c1_16, %c0_17, %c0_18, %c0_19] : memref<1x2x4x4x36xf32, #tpu.memory_space<vmem>>, vector<1x1x4x4x36xf32>
    %7 = vector.shape_cast %6 : vector<1x1x4x4x36xf32> to vector<4x4x36xf32>
    %8 = arith.addf %1, %3 : vector<2x4x1x36xf32>
    %9 = vector.shape_cast %5 : vector<4x4x36xf32> to vector<1x4x4x36xf32>
    %10 = vector.broadcast %9 : vector<1x4x4x36xf32> to vector<2x4x4x36xf32>
    %11 = vector.broadcast %8 : vector<2x4x1x36xf32> to vector<2x4x4x36xf32>
    %12 = arith.mulf %10, %11 : vector<2x4x4x36xf32>
    %13 = arith.addf %5, %7 : vector<4x4x36xf32>
    %14 = vector.shape_cast %13 : vector<4x4x36xf32> to vector<1x4x4x36xf32>
    %15 = vector.broadcast %3 : vector<2x4x1x36xf32> to vector<2x4x4x36xf32>
    %16 = vector.broadcast %14 : vector<1x4x4x36xf32> to vector<2x4x4x36xf32>
    %17 = arith.mulf %15, %16 : vector<2x4x4x36xf32>
    %18 = arith.subf %12, %17 : vector<2x4x4x36xf32>
    %cst = arith.constant dense<0.000000e+00> : vector<2x4x36xf32>
    %19 = vector.multi_reduction <add>, %18, %cst [1] : vector<2x4x4x36xf32> to vector<2x4x36xf32>
    %c0_20 = arith.constant 0 : index
    %c0_21 = arith.constant 0 : index
    %c0_22 = arith.constant 0 : index
    %c0_23 = arith.constant 0 : index
    %c0_24 = arith.constant 0 : index
    %20 = vector.load %arg3[%c0_20, %c0_21, %c0_22, %c0_23, %c0_24] : memref<1x2x2x4x36xf32, #tpu.memory_space<vmem>>, vector<1x1x2x4x36xf32>
    %21 = vector.shape_cast %20 : vector<1x1x2x4x36xf32> to vector<2x4x36xf32>
    %22 = vector.shape_cast %19 : vector<2x4x36xf32> to vector<1x1x2x4x36xf32>
    tpu.vector_store %arg3[%c0_20, %c0_21, %c0_22, %c0_23, %c0_24], %22 {strides = array<i32>} : memref<1x2x2x4x36xf32, #tpu.memory_space<vmem>>, vector<1x1x2x4x36xf32>,
    %23 = arith.subf %7, %5 : vector<4x4x36xf32>
    %24 = vector.shape_cast %23 : vector<4x4x36xf32> to vector<1x4x4x36xf32>
    %25 = vector.broadcast %1 : vector<2x4x1x36xf32> to vector<2x4x4x36xf32>
    %26 = vector.broadcast %24 : vector<1x4x4x36xf32> to vector<2x4x4x36xf32>
    %27 = arith.mulf %25, %26 : vector<2x4x4x36xf32>
    %28 = arith.addf %12, %27 : vector<2x4x4x36xf32>
    %cst_25 = arith.constant dense<0.000000e+00> : vector<2x4x36xf32>
    %29 = vector.multi_reduction <add>, %28, %cst_25 [1] : vector<2x4x4x36xf32> to vector<2x4x36xf32>
    %c0_26 = arith.constant 0 : index
    %c1_27 = arith.constant 1 : index
    %c0_28 = arith.constant 0 : index
    %c0_29 = arith.constant 0 : index
    %c0_30 = arith.constant 0 : index
    %30 = vector.load %arg3[%c0_26, %c1_27, %c0_28, %c0_29, %c0_30] : memref<1x2x2x4x36xf32, #tpu.memory_space<vmem>>, vector<1x1x2x4x36xf32>
    %31 = vector.shape_cast %30 : vector<1x1x2x4x36xf32> to vector<2x4x36xf32>
    %32 = vector.shape_cast %29 : vector<2x4x36xf32> to vector<1x1x2x4x36xf32>
    tpu.vector_store %arg3[%c0_26, %c1_27, %c0_28, %c0_29, %c0_30], %32 {strides = array<i32>} : memref<1x2x2x4x36xf32, #tpu.memory_space<vmem>>, vector<1x1x2x4x36xf32>,
    return
  }
  func.func @transform_0(%arg0: i32) -> (i32, i32, i32, i32, i32, i32) {
    %c0_i32 = arith.constant 0 : i32
    %c0_i32_0 = arith.constant 0 : i32
    %c0_i32_1 = arith.constant 0 : i32
    %c0_i32_2 = arith.constant 0 : i32
    %c0_i32_3 = arith.constant 0 : i32
    %c0_i32_4 = arith.constant 0 : i32
    return %arg0, %c0_i32, %c0_i32_0, %c0_i32_1, %c0_i32_2, %c0_i32_3 : i32, i32, i32, i32, i32, i32
  }
  func.func @transform_1(%arg0: i32) -> (i32, i32, i32, i32, i32) {
    %c0_i32 = arith.constant 0 : i32
    %c0_i32_0 = arith.constant 0 : i32
    %c0_i32_1 = arith.constant 0 : i32
    %c0_i32_2 = arith.constant 0 : i32
    %c0_i32_3 = arith.constant 0 : i32
    return %arg0, %c0_i32, %c0_i32_0, %c0_i32_1, %c0_i32_2 : i32, i32, i32, i32, i32
  }
  func.func @transform_2(%arg0: i32) -> (i32, i32, i32, i32, i32) {
    %c0_i32 = arith.constant 0 : i32
    %c0_i32_0 = arith.constant 0 : i32
    %c0_i32_1 = arith.constant 0 : i32
    %c0_i32_2 = arith.constant 0 : i32
    %c0_i32_3 = arith.constant 0 : i32
    return %arg0, %c0_i32, %c0_i32_0, %c0_i32_1, %c0_i32_2 : i32, i32, i32, i32, i32
  }
}

</mosaic_0001>

<bundles_post_ra>
// kernel: tpu_custom_call.1
= control target key start
LH: loop header
LB: loop body
LE: loop exit
PB: predicated region body
PF: predicated region fallthrough
CT: control target
= control target key end

     0   :  { %7 = vsyncpa [#allocation3], 0  ;;  %s1176_s0 = inlined_call_operand.hbm [shape: f32[2,2,2,4,1,36], index: 0, kind: input, shape index: {}]   ;;  %s1177_s1 = inlined_call_operand.hbm [shape: f32[2,2,4,4,36], index: 1, kind: input, shape index: {}]   ;;  %s1178_s2 = inlined_call_operand.hbm [shape: f32[2,2,2,4,36], index: 2, kind: output, shape index: {}]  }
   0x1   :  { %9 = vsyncpa [#allocation3 + $0x1], 0 }
   0x2   :  { %10 = vsyncpa [#allocation6], 0 }
   0x3   :  { %12 = vsyncpa [#allocation6 + $0x1], 0 }
   0x4   :  { %13 = vsyncpa [#allocation4], 0 }
   0x5   :  { %15 = vsyncpa [#allocation4 + $0x1], 0  ;;  %s814_s9 = smov 0   ;;  %s816_s10 = smov 0  }
   0x6   :  { %s818_s11 = smov 0   ;;  %s820_s12 = smov 0  }
   0x7 LB: > { %s835_s13 = sadd.s32 4294967295, %s788_s12   ;;  %s572_s14 = sadd.s32 4294967294, %s788_s12   ;;  %s788_s12 = sphi %s820_s12, %s1194_s12   ;;  %s784_s11 = sphi %s818_s11, %s1193_s11   ;;  %s780_s10 = sphi %s816_s10, %s1192_s10   ;;  %s776_s9 = sphi %s814_s9, %s1191_s9  }
   0x8   : > { %s839_s15 = sadd.s32 1, %s788_s12   ;;  %s28_s16 = sadd.s32 1, %s784_s11 }
   0x9   : > { %s25_s17 = ssub.s32 %s788_s12, %s839_s15  ;;  %p35_p0 = scmp.ne.s32.totalorder %s784_s11, %s780_s10 }
   0xa   : > { %p26_p1 = scmp.eq.s32.totalorder %s25_s17, 0  ;;  %p36_p2 = scmp.eq.s32.totalorder %s788_s12, 0 }
   0xb   : > { %p41_p3 = scmp.ne.s32.totalorder %s780_s10, %s776_s9  ;;  %p42_p4 = scmp.eq.s32.totalorder %s835_s13, 0 }
   0xc   : > { %s851_s18 = scalar_select %p26_p1, %s784_s11, %s28_s16  }
   0xd   : > { %p853_p5 = por %p36_p2, %p35_p0  ;;  %p857_p6 = por %p42_p4, %p41_p3 }
   0xe   : > { %p91_p7 = scmp.eq.s32.totalorder %s835_s13, 1  ;;  %p97_p8 = scmp.eq.s32.totalorder %s572_s14, 1 }
   0xf   : > { %s1182_s20 = scalar_select %p857_p6, 1, 0 }
  0x10   : > { %p624_p10 = scmp.lt.s32.totalorder %s788_s12, 2  ;;  %p864_p11 = por %p91_p7, %p35_p0 }
  0x11   : > { %p868_p12 = por %p97_p8, %p41_p3  ;;  %s873_s23 = sand.u32 1, %s784_s11  }
  0x12   : > { %s1183_s21 = scalar_select %p864_p11, 1, 0 }
  0x13   : > { %s1184_s22 = scalar_select %p868_p12, 1, 0 }
  0x14   : > { %s604_s24 = sshll.u32 %s788_s12, 8  ;;  %s575_s25 = sshll.u32 %s873_s23, 4 }
  0x15   : > { %s880_s28 = scalar_lea.hbm %s1176_s0, %s604_s24  ;;  %s121_s29 = scalar_lea.vmem [#allocation2], %s575_s25 }
  0x16   : > { %s128_s30 = sshll.u32 %s121_s29, 4  ;;  %p884_p13 = pnand %p624_p10, %p853_p5  ;;  %s888_s30 = int_to_ptr.vmem [resolvable:$true] %s128_s30 }
  0x17   : > { %s118_s4 = scalar_lea.sflag [#allocation3], %s873_s23  ;;  %s664_s5 = scalar_lea.hbm %s880_s28, 256 }
  0x18   : > { %p665_p0 = scmp.ne.s32.totalorder %s880_s28, %s664_s5  ;;  %p666_p1 = pneg %p884_p13 }
  0x19   : > { %s669_s8 = scalar_lea.hbm %s1176_s0, 512  ;;  %p670_p4 = scmp.lt.s32.totalorder %s880_s28, %s1176_s0 }
  0x1a   : > { %p667_p2 = pnand %p666_p1, %p665_p0  ;;  %p671_p5 = scmp.lt.s32.totalorder %s669_s8, %s664_s5 }
  0x1c   : > { %p668_p3 = pneg %p667_p2  ;;  %p672_p7 = por %p671_p5, %p670_p4 }
  0x1e   : > { %p673_p8 = pnand %p672_p7, %p668_p3 }
  0x20   : > { %676 = shalt.err (!%p673_p8)
}
  0x21   : > { %s677_s17 = scalar_lea.vmem %s888_s30, 256  ;;  %s790_s19 = smov [#allocation2]  }
  0x22   : > { %p678_p10 = scmp.ne.s32.totalorder %s888_s30, %s677_s17  ;;  %s682_s24 = sshll.u32 %s790_s19, 4  ;;  %s683_s24 = int_to_ptr.vmem [resolvable:$false] %s682_s24 }
  0x23   : > { %s684_s25 = scalar_lea.vmem %s683_s24, 512  ;;  %p685_p9 = scmp.lt.s32.totalorder %s888_s30, %s683_s24 }
  0x24   : > { %p680_p0 = pnand %p678_p10, %p666_p1  ;;  %p686_p12 = scmp.lt.s32.totalorder %s684_s25, %s677_s17 }
  0x26   : > { %p681_p2 = pneg %p680_p0  ;;  %p687_p11 = por %p686_p12, %p685_p9 }
  0x28   : > { %p688_p4 = pnand %p687_p11, %p681_p2 }
  0x2a   : > { %691 = shalt.err (!%p688_p4)
}
  0x2b   : > { %s791_s26 = smov 16   ;;  %s792_s27 = smov 1  }
  0x2c   : > { %616 = dma.hbm_to_vmem [thread:$0]  (!%p884_p13), %s880_s28, 256, %s888_s30, %s118_s4, %s791_s26, %s791_s26, %s792_s27  }
  0x2d   : > { %p581_p3 = scmp.ge.s32.totalorder %s788_s12, 1  ;;  %p157_p5 = scmp.lt.s32.totalorder %s788_s12, 3 }
  0x2e   : > { %s578_s29 = sshll.u32 %s873_s23, 5  ;;  %s605_s6 = sshll.u32 %s788_s12, 9 }
  0x2f   : > { %p920_p9 = pnand %p581_p3, %p157_p5  ;;  %s142_s7 = scalar_lea.vmem [#allocation5], %s578_s29 }
  0x30   : > { %s149_s8 = sshll.u32 %s142_s7, 4  ;;  %s928_s17 = scalar_lea.hbm %s1177_s1, %s605_s6  ;;  %s930_s8 = int_to_ptr.vmem [resolvable:$true] %s149_s8 }
  0x31   : > { %s139_s28 = scalar_lea.sflag [#allocation6], %s873_s23  ;;  %s692_s30 = scalar_lea.hbm %s928_s17, 512 }
  0x32   : > { %p693_p11 = scmp.ne.s32.totalorder %s928_s17, %s692_s30  ;;  %s697_s24 = scalar_lea.hbm %s1177_s1, 1024 }
  0x33   : > { %p698_p8 = scmp.lt.s32.totalorder %s928_s17, %s1177_s1  ;;  %p699_p10 = scmp.lt.s32.totalorder %s697_s24, %s692_s30 }
  0x34   : > { %p695_p12 = pnand %p693_p11, %p666_p1 }
  0x35   : > { %p700_p0 = por %p699_p10, %p698_p8 }
  0x36   : > { %p696_p7 = pneg %p695_p12 }
  0x38   : > { %p701_p2 = pnand %p700_p0, %p696_p7 }
  0x3a   : > { %704 = shalt.err (!%p701_p2)
}
  0x3b   : > { %s705_s27 = scalar_lea.vmem %s930_s8, 512  ;;  %s793_s29 = smov [#allocation5]  }
  0x3c   : > { %p706_p4 = scmp.ne.s32.totalorder %s930_s8, %s705_s27  ;;  %s710_s6 = sshll.u32 %s793_s29, 4  ;;  %s711_s6 = int_to_ptr.vmem [resolvable:$false] %s710_s6 }
  0x3d   : > { %s712_s7 = scalar_lea.vmem %s711_s6, 1024  ;;  %p713_p11 = scmp.lt.s32.totalorder %s930_s8, %s711_s6 }
  0x3e   : > { %p708_p3 = pnand %p706_p4, %p666_p1  ;;  %p714_p12 = scmp.lt.s32.totalorder %s712_s7, %s705_s27 }
  0x40   : > { %p709_p5 = pneg %p708_p3  ;;  %p715_p6 = por %p714_p12, %p713_p11 }
  0x42   : > { %p716_p8 = pnand %p715_p6, %p709_p5 }
  0x44   : > { %719 = shalt.err (!%p716_p8)
}
  0x45   : > { %s794_s14 = smov 64   ;;  %s795_s16 = smov 4  }
  0x46   : > { %619 = dma.hbm_to_vmem [thread:$0]  (!%p884_p13), %s928_s17, 512, %s930_s8, %s139_s28, %s794_s14, %s794_s14, %s795_s16  }
  0x47   : > { %161 = sbr.rel (%p920_p9) target bundleno = 132 (0x84), region = 28  ;;  %s960_s30 = sand.u32 (!%p920_p9), 1, %s780_s10  }
  0x48   : > { %s582_s4 = sshll.u32 (!%p920_p9), %s960_s30, 4  ;;  %s164_s19 = scalar_lea.sflag (!%p920_p9), [#allocation3], %s960_s30 }
  0x49   : > { %s966_s24 = scalar_lea.vmem (!%p920_p9), [#allocation2], %s582_s4  ;;  %p1187_p6 = scmp.ne.s32.totalorder (!%p920_p9), %s1182_s20, 0 }
  0x4c   : > { %763 = dma.done.wait (%p1187_p6), %s164_s19, 256  }
  0x4d   : > { %765 = vsyncadd (%p1187_p6), %s164_s19, 4294967040  ;;  %s583_s23 = sshll.u32 %s960_s30, 5  ;;  %s173_s3 = scalar_lea.sflag [#allocation6], %s960_s30 }
  0x4e   : > { %s974_s5 = scalar_lea.vmem [#allocation5], %s583_s23 }
  0x4f   : > { %767 = dma.done.wait (%p1187_p6), %s173_s3, 512  }
  0x50   : > { %769 = vsyncadd (%p1187_p6), %s173_s3, 4294966784  ;;  %v244_v0 = vlaneseq  ;;  %v983_v3 = vld [vmem:[%s966_s24] sm:$0x1]  ;;  %v986_v4 = vld [vmem:[%s966_s24 + $0x1] sm:$0x1]  ;;  %vm360_vm0 = vcmask 289792  }
  0x51   : > { %v989_v5 = vld [vmem:[%s966_s24 + $0x2] sm:$0x1]  ;;  %v992_v6 = vld [vmem:[%s966_s24 + $0x3] sm:$0x1]  ;;  %v585_v7 = vld [vmem:[%s966_s24 + $0x8] sm:$0x1] }
  0x52   : > { %v245_v1 = vshrl.u32 %v244_v0, 7  ;;  %v586_v8 = vld [vmem:[%s966_s24 + $0x9] sm:$0x1]  ;;  %v587_v11 = vld [vmem:[%s966_s24 + $0xa] sm:$0x1]  ;;  %v228_v14 = vadd.f32 %v585_v7, %v983_v3  ;;  %s1090_s20 = scalar_lea.vmem [#allocation7], %s582_s4 }
  0x53   : > { %v588_v12 = vld [vmem:[%s966_s24 + $0xb] sm:$0x1]  ;;  %v1003_v13 = vld [vmem:[%s974_s5] sm:$0xf]  ;;  %v229_v15 = vadd.f32 %v586_v8, %v986_v4  ;;  %v1011_v18 = vld [vmem:[%s974_s5 + $0x4] sm:$0xf]  ;;  %v230_v21 = vadd.f32 %v587_v11, %v989_v5 }
  0x54   : > { %v980_v2 = vsub.s32 0, %v245_v1  ;;  %v1014_v19 = vld [vmem:[%s974_s5 + $0x8] sm:$0xf]  ;;  %v1017_v20 = vld [vmem:[%s974_s5 + $0xc] sm:$0xf]  ;;  %v231_v22 = vadd.f32 %v588_v12, %v992_v6  ;;  %s476_s8 = sshll.u32 %s1090_s20, 4  ;;  %s1126_s8 = int_to_ptr.vmem [resolvable:$true] %s476_s8 }
  0x55   : > { %v593_v25 = vld [vmem:[%s974_s5 + $0x10] sm:$0xf]  ;;  %v594_v26 = vld [vmem:[%s974_s5 + $0x14] sm:$0xf]  ;;  %v595_v27 = vld [vmem:[%s974_s5 + $0x18] sm:$0xf] }
  0x56   : > { %v392_v9 = vrot.slane %v983_v3, %v980_v2  ;;  %v396_v10 = vrot.slane %v986_v4, %v980_v2  ;;  %v307_v16 = vrot.slane %v585_v7, %v980_v2  ;;  %v400_v17 = vrot.slane %v989_v5, %v980_v2  ;;  %v596_v32 = vld [vmem:[%s974_s5 + $0x1c] sm:$0xf]  ;;  %v1037_v37 = vld [vmem:[%s966_s24 + $0x4] sm:$0x1]  ;;  %v1040_v38 = vld [vmem:[%s966_s24 + $0x5] sm:$0x1] }
  0x57   : > { %v311_v23 = vrot.slane %v586_v8, %v980_v2  ;;  %v315_v24 = vrot.slane %v587_v11, %v980_v2  ;;  %v247_v28 = vrot.slane %v228_v14, %v980_v2  ;;  %v251_v29 = vrot.slane %v229_v15, %v980_v2  ;;  %v1047_v43 = vld [vmem:[%s966_s24 + $0x6] sm:$0x1]  ;;  %v1050_v44 = vld [vmem:[%s966_s24 + $0x7] sm:$0x1]  ;;  %v589_v45 = vld [vmem:[%s966_s24 + $0xc] sm:$0x1] }
  0x58   : > { %v319_v30 = vrot.slane %v588_v12, %v980_v2  ;;  %v404_v31 = vrot.slane %v992_v6, %v980_v2  ;;  %v255_v33 = vrot.slane %v230_v21, %v980_v2  ;;  %v259_v34 = vrot.slane %v231_v22, %v980_v2  ;;  %v590_v50 = vld [vmem:[%s966_s24 + $0xd] sm:$0x1]  ;;  %v591_v51 = vld [vmem:[%s966_s24 + $0xe] sm:$0x1]  ;;  %v592_v52 = vld [vmem:[%s966_s24 + $0xf] sm:$0x1] }
  0x59   : > { %v292_v35 = vadd.f32 %v593_v25, %v1003_v13  ;;  %v293_v36 = vadd.f32 %v594_v26, %v1011_v18  ;;  %v284_v39 = vmul.f32 %v247_v28, %v1003_v13  ;;  %v285_v40 = vmul.f32 %v251_v29, %v1011_v18  ;;  %s606_s17 = sshll.u32 %s835_s13, 8  ;;  %s463_s27 = scalar_lea.sflag [#allocation4], %s960_s30 }
  0x5a   : > { %v294_v41 = vadd.f32 %v595_v27, %v1014_v19  ;;  %v295_v42 = vadd.f32 %v596_v32, %v1017_v20  ;;  %v286_v46 = vmul.f32 %v255_v33, %v1014_v19  ;;  %v287_v47 = vmul.f32 %v259_v34, %v1017_v20  ;;  %s1131_s26 = scalar_lea.hbm %s1178_s2, %s606_s17  ;;  %s720_s29 = scalar_lea.vmem %s1126_s8, 256 }
  0x5b   : > { %v344_v48 = vmul.f32 %v307_v16, %v292_v35  ;;  %v345_v49 = vmul.f32 %v311_v23, %v293_v36  ;;  %v232_v55 = vadd.f32 %v589_v45, %v1037_v37  ;;  %v233_v56 = vadd.f32 %v590_v50, %v1040_v38  ;;  %p721_p13 = scmp.ne.s32.totalorder %s1126_s8, %s720_s29  ;;  %p1188_p1 = scmp.ne.s32.totalorder %s1183_s21, 0 }
  0x5c   : > { %v346_v53 = vmul.f32 %v315_v24, %v294_v41  ;;  %v347_v54 = vmul.f32 %v319_v30, %v295_v42  ;;  %v234_v59 = vadd.f32 %v591_v51, %v1047_v43  ;;  %v235_v60 = vadd.f32 %v592_v52, %v1050_v44  ;;  %s796_s13 = smov [#allocation7]  }
  0x5d   : > { %v352_v57 = vsub.f32 %v284_v39, %v344_v48  ;;  %v353_v58 = vsub.f32 %v285_v40, %v345_v49  ;;  %v263_v63 = vrot.slane %v232_v55, %v980_v2  ;;  %v267_v0 = vrot.slane %v233_v56, %v980_v2  ;;  %p722_p9 = pnand %p721_p13, %p1188_p1  ;;  %s724_s6 = sshll.u32 %s796_s13, 4  ;;  %s725_s6 = int_to_ptr.vmem [resolvable:$false] %s724_s6 }
  0x5e   : > { %v354_v61 = vsub.f32 %v286_v46, %v346_v53  ;;  %v355_v62 = vsub.f32 %v287_v47, %v347_v54  ;;  %v271_v8 = vrot.slane %v234_v59, %v980_v2  ;;  %v275_v11 = vrot.slane %v235_v60, %v980_v2  ;;  %s726_s7 = scalar_lea.vmem %s725_s6, 512  ;;  %p727_p10 = scmp.lt.s32.totalorder %s1126_s8, %s725_s6 }
  0x5f   : > { %v361_v1 = vsel %vm360_vm0, %v352_v57, 0.0  ;;  %v362_v7 = vsel %vm360_vm0, %v353_v58, 0.0  ;;  %v288_v16 = vmul.f32 %v263_v63, %v1003_v13  ;;  %v289_v21 = vmul.f32 %v267_v0, %v1011_v18  ;;  %p723_p7 = pneg %p722_p9  ;;  %p728_p0 = scmp.lt.s32.totalorder %s726_s7, %s720_s29 }
  0x60   : > { %v363_v12 = vadd.f32 %v362_v7, %v361_v1  ;;  %v364_v14 = vsel %vm360_vm0, %v354_v61, 0.0  ;;  %v366_v15 = vsel %vm360_vm0, %v355_v62, 0.0  ;;  %v290_v22 = vmul.f32 %v271_v8, %v1014_v19 }
  0x61   : > { %v291_v23 = vmul.f32 %v275_v11, %v1017_v20  ;;  %v323_v24 = vrot.slane %v589_v45, %v980_v2  ;;  %v327_v29 = vrot.slane %v590_v50, %v980_v2  ;;  %v331_v30 = vrot.slane %v591_v51, %v980_v2  ;;  %p729_p2 = por %p728_p0, %p727_p10 }
  0x62   : > { %v365_v28 = vadd.f32 %v364_v14, %v363_v12  ;;  %v335_v33 = vrot.slane %v592_v52, %v980_v2  ;;  %v377_v48 = vsub.f32 %v593_v25, %v1003_v13  ;;  %v378_v49 = vsub.f32 %v594_v26, %v1011_v18 }
  0x63   : > { %v348_v34 = vmul.f32 %v323_v24, %v292_v35  ;;  %v379_v53 = vsub.f32 %v595_v27, %v1014_v19  ;;  %v349_v55 = vmul.f32 %v327_v29, %v293_v36  ;;  %v350_v56 = vmul.f32 %v331_v30, %v294_v41  ;;  %p730_p4 = pnand %p729_p2, %p723_p7 }
  0x64   : > { %v367_v54 = vadd.f32 %v366_v15, %v365_v28  ;;  %v351_v57 = vmul.f32 %v335_v33, %v295_v42  ;;  %v380_v58 = vsub.f32 %v596_v32, %v1017_v20  ;;  %v429_v50 = vmul.f32 %v392_v9, %v377_v48 }
  0x65   : > { %v356_v45 = vsub.f32 %v288_v16, %v348_v34  ;;  %v430_v35 = vmul.f32 %v396_v10, %v378_v49  ;;  %v357_v13 = vsub.f32 %v289_v21, %v349_v55  ;;  %v358_v18 = vsub.f32 %v290_v22, %v350_v56 }
  0x66   : > { %375 = vst.msk [vmem:[%s1090_s20] sm:$0xf] %vm360_vm0, %v367_v54  ;;  %v359_v19 = vsub.f32 %v291_v23, %v351_v57  ;;  %v431_v20 = vmul.f32 %v400_v17, %v379_v53  ;;  %v432_v4 = vmul.f32 %v404_v31, %v380_v58  ;;  %v437_v9 = vadd.f32 %v429_v50, %v284_v39 }
  0x67   : > { %v368_v3 = vsel %vm360_vm0, %v356_v45, 0.0  ;;  %v438_v10 = vadd.f32 %v430_v35, %v285_v40  ;;  %v369_v25 = vsel %vm360_vm0, %v357_v13, 0.0  ;;  %v371_v26 = vsel %vm360_vm0, %v358_v18, 0.0 }
  0x68   : > { %v373_v27 = vsel %vm360_vm0, %v359_v19, 0.0  ;;  %v439_v32 = vadd.f32 %v431_v20, %v286_v46  ;;  %v370_v36 = vadd.f32 %v369_v25, %v368_v3  ;;  %v440_v41 = vadd.f32 %v432_v4, %v287_v47 }
  0x69   : > { %v445_v5 = vsel %vm360_vm0, %v437_v9, 0.0  ;;  %v446_v17 = vsel %vm360_vm0, %v438_v10, 0.0  ;;  %v408_v6 = vrot.slane %v1037_v37, %v980_v2  ;;  %v412_v31 = vrot.slane %v1040_v38, %v980_v2 }
  0x6a   : > { %v447_v42 = vadd.f32 %v446_v17, %v445_v5  ;;  %v448_v51 = vsel %vm360_vm0, %v439_v32, 0.0  ;;  %v372_v39 = vadd.f32 %v371_v26, %v370_v36  ;;  %v450_v40 = vsel %vm360_vm0, %v440_v41, 0.0 }
  0x6b   : > { %v416_v46 = vrot.slane %v1047_v43, %v980_v2  ;;  %v420_v47 = vrot.slane %v1050_v44, %v980_v2  ;;  %v433_v59 = vmul.f32 %v408_v6, %v377_v48  ;;  %v434_v60 = vmul.f32 %v412_v31, %v378_v49 }
  0x6c   : > { %v449_v52 = vadd.f32 %v448_v51, %v447_v42  ;;  %v374_v61 = vadd.f32 %v373_v27, %v372_v39 }
  0x6d   : > { %v435_v37 = vmul.f32 %v416_v46, %v379_v53  ;;  %v436_v62 = vmul.f32 %v420_v47, %v380_v58  ;;  %v441_v38 = vadd.f32 %v433_v59, %v288_v16  ;;  %v442_v0 = vadd.f32 %v434_v60, %v289_v21 }
  0x6e   : > { %v451_v63 = vadd.f32 %v450_v40, %v449_v52  ;;  %376 = vst.msk [vmem:[%s1090_s20 + $0x4] sm:$0xf] %vm360_vm0, %v374_v61 }
  0x6f   : > { %v443_v1 = vadd.f32 %v435_v37, %v290_v22  ;;  %v444_v43 = vadd.f32 %v436_v62, %v291_v23  ;;  %v452_v2 = vsel %vm360_vm0, %v441_v38, 0.0  ;;  %v453_v44 = vsel %vm360_vm0, %v442_v0, 0.0 }
  0x70   : > { %597 = vst.msk [vmem:[%s1090_s20 + $0x8] sm:$0xf] %vm360_vm0, %v451_v63  ;;  %v454_v7 = vadd.f32 %v453_v44, %v452_v2 }
  0x71   : > { %v455_v8 = vsel %vm360_vm0, %v443_v1, 0.0  ;;  %v457_v11 = vsel %vm360_vm0, %v444_v43, 0.0 }
  0x72   : > { %v456_v12 = vadd.f32 %v455_v8, %v454_v7 }
  0x74   : > { %v458_v14 = vadd.f32 %v457_v11, %v456_v12 }
  0x76   : > { %598 = vst.msk [vmem:[%s1090_s20 + $0xc] sm:$0xf] %vm360_vm0, %v458_v14 }
  0x77   : > { %733 = shalt.err (!%p730_p4)
}
  0x78   : > { %s734_s14 = scalar_lea.hbm %s1131_s26, 256  ;;  %s738_s19 = scalar_lea.hbm %s1178_s2, 512 }
  0x79   : > { %p735_p3 = scmp.ne.s32.totalorder %s1131_s26, %s734_s14  ;;  %p739_p12 = scmp.lt.s32.totalorder %s1131_s26, %s1178_s2 }
  0x7a   : > { %p740_p8 = scmp.lt.s32.totalorder %s738_s19, %s734_s14 }
  0x7b   : > { %p736_p5 = pnand %p735_p3, %p1188_p1 }
  0x7c   : > { %p741_p6 = por %p740_p8, %p739_p12 }
  0x7d   : > { %p737_p11 = pneg %p736_p5 }
  0x7f   : > { %p742_p13 = pnand %p741_p6, %p737_p11 }
  0x81   : > { %745 = shalt.err (!%p742_p13)
}
  0x82   : > { %s797_s3 = smov 64   ;;  %s798_s5 = smov 4  }
  0x83   : > { %611 = dma.vmem_to_hbm [thread:$0]  (%p1188_p1), %s1126_s8, 256, %s1131_s26, %s463_s27, %s797_s3, %s797_s3, %s798_s5  }
  0x84 PF: > { %s491_s20 = sand.u32 1, %s776_s9   ;;  %p1189_p9 = scmp.ne.s32.totalorder %s1184_s22, 0 }
  0x85   : > { %p1190_p7 = scmp.ge.s32.totalorder %s788_s12, 2  ;;  %s492_s17 = scalar_lea.sflag [#allocation4], %s491_s20 }
  0x87   : > { %p621_p10 = pnand %p1190_p7, %p1189_p9 }
  0x89   : > { %p622_p0 = pneg %p621_p10 }
  0x8b   : > { %771 = dma.done.wait (%p622_p0), %s492_s17, 256  }
  0x8c   : > { %773 = vsyncadd (%p622_p0), %s492_s17, 4294967040  ;;  %p18_p2 = scmp.ge.s32.totalorder %s839_s15, 4   ;;  %s1191_s9 = smov %s780_s10 }
  0x8d   : > { %s1192_s10 = smov %s784_s11  ;;  %s1193_s11 = smov %s851_s18 }
  0x8e   : > { %s1194_s12 = smov %s839_s15  ;;  %20 = sbr.rel (!%p18_p2) target bundleno = 7 (0x7), region = 89 }
  0x93   :  { %497 = vsyncpa [#allocation3], 1 }
  0x94   :  { %499 = vsyncpa [#allocation3 + $0x1], 1 }
  0x95   :  { %500 = vsyncpa [#allocation6], 1 }
  0x96   :  { %502 = vsyncpa [#allocation6 + $0x1], 1 }
  0x97   :  { %503 = vsyncpa [#allocation4], 1 }
  0x98   :  { %505 = vsyncpa [#allocation4 + $0x1], 1 }

</bundles_post_ra>
